<compile_context>
chip_gen: v6e
topology: v6e:2x2x1
jax: 0.10.0
libtpu: 0.0.40
codegen_flags: <defaults>
</compile_context>

<pallas_src>
import functools

import jax
import jax.numpy as jnp
from jax.experimental import pallas as pl
from jax.experimental.pallas import tpu as pltpu


_LANE = 128
_SUBLANE = 8
_MAX_TILE_B = 512      # per-step batch-tile ceiling (measured ~85% HBM roofline)
_SINGLE_TILE_B = 256   # at/below this, run as a single block (latency path)


def _round_up(n, m):
    return ((n + m - 1) // m) * m


def _choose_tiling(batch):
    """Returns (tile_b, num_tiles): 8-aligned, balanced, tail-aware tiles."""
    bp8 = _round_up(max(batch, _SUBLANE), _SUBLANE)
    if bp8 <= _SINGLE_TILE_B:
        return bp8, 1
    # >= 2 tiles so v7x's two TensorCores both get work; balance so the tail
    # tile isn't mostly padding (B=300 -> 2 x 152, not 2 x 256).
    n_tiles = max(pl.cdiv(bp8, _MAX_TILE_B), 2)
    tb = _round_up(pl.cdiv(bp8, n_tiles), _SUBLANE)
    return tb, n_tiles


def _gaussian_actor_kernel(x_ref, w_ref, b_ref, out_ref, *, in_rows, action_dim):
    """Body MLP + fused (mu|std) head; exp() applied to the std lanes."""
    x = x_ref[...].astype(w_ref.dtype)
    # x block is only `in_rows` lanes wide; dot against the matching
    # sublane-aligned static slice of the first weight plane.
    w1 = w_ref[0, :in_rows, :]
    h = jnp.tanh(jnp.dot(x, w1, preferred_element_type=jnp.float32) + b_ref[0])
    h = jnp.tanh(
        jnp.dot(h.astype(w_ref.dtype), w_ref[1],
                preferred_element_type=jnp.float32) + b_ref[1])
    head = (jnp.dot(h.astype(w_ref.dtype), w_ref[2],
                    preferred_element_type=jnp.float32) + b_ref[2])
    # Lanes [0, A) are mu, lanes [A, 2A) are log-std -> exp; rest is zero pad.
    # (1, P) mask row broadcasts in the where; no (tb, P) int32 iota per step.
    col = jax.lax.broadcasted_iota(jnp.int32, (1, head.shape[1]), 1)
    # TODO(synk): exp() is intentionally unclamped to match the PyTorch module.
    out_ref[...] = jnp.where(col >= action_dim, jnp.exp(head),
                             head).astype(out_ref.dtype)


def prepare_params(params, state_dim, action_dim, hidden_size,
                   dtype=jnp.float32):
    """One-time packing of PyTorch-layout (out,in) params into padded slabs.

    dtype=jnp.bfloat16 halves the resident-weight DMA for the per-env-step
    (tiny batch) path; accumulation stays f32 in-kernel.  Default f32 keeps the
    1e-5 correctness tolerance.
    """
    P = _round_up(max(state_dim, hidden_size, 2 * action_dim), _LANE)
    S_pad = _round_up(state_dim, _SUBLANE)
    w = jnp.zeros((3, P, P), dtype)
    w = w.at[0, :state_dim, :hidden_size].set(params["w1"].T.astype(dtype))
    w = w.at[1, :hidden_size, :hidden_size].set(params["w2"].T.astype(dtype))
    w = w.at[2, :hidden_size, :action_dim].set(params["mu_w"].T.astype(dtype))
    w = w.at[2, :hidden_size, action_dim:2 * action_dim].set(
        params["std_w"].T.astype(dtype))
    b = jnp.zeros((3, 1, P), jnp.float32)
    b = b.at[0, 0, :hidden_size].set(params["b1"].astype(jnp.float32))
    b = b.at[1, 0, :hidden_size].set(params["b2"].astype(jnp.float32))
    b = b.at[2, 0, :action_dim].set(params["mu_b"].astype(jnp.float32))
    b = b.at[2, 0, action_dim:2 * action_dim].set(
        params["std_b"].astype(jnp.float32))
    return dict(w=w, b=b, P=P, state_dim=state_dim, state_pad=S_pad,
                action_dim=action_dim)


def gaussian_actor_forward(x, prep):
    """x: [B, state_dim] f32. Returns (pi_mu, pi_sigma), each [B, action_dim]."""
    B, S_in = x.shape
    P, S, Sp, A = prep["P"], prep["state_dim"], prep["state_pad"], prep["action_dim"]
    assert S_in == S
    w, b = prep["w"], prep["b"]

    tb, n_tiles = _choose_tiling(B)
    Bp = tb * n_tiles

    # Pad batch only to the (small, 8-aligned, balanced) tile multiple and the
    # feature dim only up to the next multiple of 8 (no-op for S=16).
    xp = x
    if Bp != B or Sp != S:
        xp = jnp.pad(x, ((0, Bp - B), (0, Sp - S)))

    out = pl.pallas_call(
        functools.partial(_gaussian_actor_kernel, in_rows=Sp, action_dim=A),
        out_shape=jax.ShapeDtypeStruct((Bp, P), jnp.float32),
        grid=(n_tiles,),
        in_specs=[
            pl.BlockSpec((tb, Sp), lambda i: (i, 0)),          # activations
            pl.BlockSpec((3, P, P), lambda i: (0, 0, 0)),      # weight slab
            pl.BlockSpec((3, 1, P), lambda i: (0, 0, 0)),      # bias slab
        ],
        out_specs=pl.BlockSpec((tb, P), lambda i: (i, 0)),
        compiler_params=pltpu.CompilerParams(
            dimension_semantics=("parallel",)),
    )(xp, w, b)

    # One narrow slice of the padded output, then split mu / sigma from it.
    head = out[:B, :2 * A]
    return head[:, :A], head[:, A:]


def init_params(key, state_dim, action_dim, hidden_size):
    """Deterministic synthetic parameters matching nn.Linear shapes (out, in)."""
    ks = jax.random.split(key, 8)

    def lin(kw, kb, out_f, in_f):
        bound = 1.0 / jnp.sqrt(in_f)
        w = jax.random.uniform(kw, (out_f, in_f), jnp.float32, -bound, bound)
        bb = jax.random.uniform(kb, (out_f,), jnp.float32, -bound, bound)
        return w, bb

    w1, b1 = lin(ks[0], ks[1], hidden_size, state_dim)
    w2, b2 = lin(ks[2], ks[3], hidden_size, hidden_size)
    mw, mb = lin(ks[4], ks[5], action_dim, hidden_size)
    sw, sb = lin(ks[6], ks[7], action_dim, hidden_size)
    return dict(w1=w1, b1=b1, w2=w2, b2=b2, mu_w=mw, mu_b=mb, std_w=sw, std_b=sb)


def reference_forward(x, p):
    h1 = jnp.tanh(x @ p["w1"].T + p["b1"])
    h2 = jnp.tanh(h1 @ p["w2"].T + p["b2"])
    mu = h2 @ p["mu_w"].T + p["mu_b"]
    sigma = jnp.exp(h2 @ p["std_w"].T + p["std_b"])
    return mu, sigma


if __name__ == "__main__":
    state_dim, action_dim, hidden_size = 16, 4, 32

    key = jax.random.PRNGKey(0)
    kx, kp, kx2 = jax.random.split(key, 3)
    params = init_params(kp, state_dim, action_dim, hidden_size)
    prep = prepare_params(params, state_dim, action_dim, hidden_size)

    # Small batch (per-env-step call pattern) -> single 8-row block.
    B = 2
    x = jax.random.normal(kx, (B, state_dim), dtype=jnp.float32)
    pi_mu, pi_sigma = gaussian_actor_forward(x, prep)
    jax.block_until_ready((pi_mu, pi_sigma))

    ref_mu, ref_sigma = reference_forward(x, params)
    assert pi_mu.shape == (B, action_dim) and pi_sigma.shape == (B, action_dim)
    assert jnp.allclose(pi_mu, ref_mu, atol=1e-5, rtol=1e-5)
    assert jnp.allclose(pi_sigma, ref_sigma, atol=1e-5, rtol=1e-5)
    assert bool(jnp.all(pi_sigma > 0))

    # Larger, awkward batch exercises the balanced tail-aware grid (2 x 152
    # tiles) with VMEM-resident weights.
    B2 = 300
    x2 = jax.random.normal(kx2, (B2, state_dim), dtype=jnp.float32)
    mu2, sig2 = gaussian_actor_forward(x2, prep)
    jax.block_until_ready((mu2, sig2))
    rmu2, rsig2 = reference_forward(x2, params)
    assert mu2.shape == (B2, action_dim) and sig2.shape == (B2, action_dim)
    assert jnp.allclose(mu2, rmu2, atol=1e-5, rtol=1e-5)
    assert jnp.allclose(sig2, rsig2, atol=1e-5, rtol=1e-5)

    print("KERNEL_OK")
</pallas_src>

<mosaic_0001>
module attributes {stable_mosaic.version = 11 : i64} {
  func.func @_gaussian_actor_kernel(%arg0: i32, %arg1: memref<8x16xf32, #tpu.memory_space<vmem>>, %arg2: memref<3x128x128xf32, #tpu.memory_space<vmem>>, %arg3: memref<3x1x128xf32, #tpu.memory_space<vmem>>, %arg4: memref<8x128xf32, #tpu.memory_space<vmem>>) attributes {dimension_semantics = [#tpu.dimension_semantics<parallel>], iteration_bounds = array<i64: 1>, scalar_prefetch = 0 : i64, scratch_operands = 0 : i64, tpu.core_type = #tpu.core_type<tc>, window_params = [{transform_indices = @transform_0, window_bounds = array<i64: 8, 16>}, {pipeline_mode = #tpu.pipeline_mode<synchronous>, transform_indices = @transform_1, window_bounds = array<i64: 3, 128, 128>}, {pipeline_mode = #tpu.pipeline_mode<synchronous>, transform_indices = @transform_2, window_bounds = array<i64: 3, 1, 128>}, {transform_indices = @transform_3, window_bounds = array<i64: 8, 128>}]} {
    %c0 = arith.constant 0 : index
    %c0_0 = arith.constant 0 : index
    %0 = vector.load %arg1[%c0, %c0_0] : memref<8x16xf32, #tpu.memory_space<vmem>>, vector<8x16xf32>
    %c0_1 = arith.constant 0 : index
    %c0_2 = arith.constant 0 : index
    %c0_3 = arith.constant 0 : index
    %1 = vector.load %arg2[%c0_1, %c0_2, %c0_3] : memref<3x128x128xf32, #tpu.memory_space<vmem>>, vector<1x16x128xf32>
    %2 = vector.shape_cast %1 : vector<1x16x128xf32> to vector<16x128xf32>
    %cst = arith.constant dense<0.000000e+00> : vector<8x128xf32>
    %3 = tpu.matmul %0, %2, %cst {dimension_numbers = #tpu.dot_dimension_numbers<[1], [0], [0], [1], [0, 0, 1, 1], [], []>} : vector<8x16xf32>, vector<16x128xf32>, vector<8x128xf32> -> vector<8x128xf32>
    %c0_4 = arith.constant 0 : index
    %c0_5 = arith.constant 0 : index
    %c0_6 = arith.constant 0 : index
    %4 = vector.load %arg3[%c0_4, %c0_5, %c0_6] : memref<3x1x128xf32, #tpu.memory_space<vmem>>, vector<1x1x128xf32>
    %5 = vector.shape_cast %4 : vector<1x1x128xf32> to vector<1x128xf32>
    %6 = vector.broadcast %5 : vector<1x128xf32> to vector<8x128xf32>
    %7 = arith.addf %3, %6 : vector<8x128xf32>
    %8 = math.tanh %7 : vector<8x128xf32>
    %c1 = arith.constant 1 : index
    %c0_7 = arith.constant 0 : index
    %c0_8 = arith.constant 0 : index
    %9 = vector.load %arg2[%c1, %c0_7, %c0_8] : memref<3x128x128xf32, #tpu.memory_space<vmem>>, vector<1x128x128xf32>
    %10 = vector.shape_cast %9 : vector<1x128x128xf32> to vector<128x128xf32>
    %cst_9 = arith.constant dense<0.000000e+00> : vector<8x128xf32>
    %11 = tpu.matmul %8, %10, %cst_9 {dimension_numbers = #tpu.dot_dimension_numbers<[1], [0], [0], [1], [0, 0, 1, 1], [], []>} : vector<8x128xf32>, vector<128x128xf32>, vector<8x128xf32> -> vector<8x128xf32>
    %c1_10 = arith.constant 1 : index
    %c0_11 = arith.constant 0 : index
    %c0_12 = arith.constant 0 : index
    %12 = vector.load %arg3[%c1_10, %c0_11, %c0_12] : memref<3x1x128xf32, #tpu.memory_space<vmem>>, vector<1x1x128xf32>
    %13 = vector.shape_cast %12 : vector<1x1x128xf32> to vector<1x128xf32>
    %14 = vector.broadcast %13 : vector<1x128xf32> to vector<8x128xf32>
    %15 = arith.addf %11, %14 : vector<8x128xf32>
    %16 = math.tanh %15 : vector<8x128xf32>
    %c2 = arith.constant 2 : index
    %c0_13 = arith.constant 0 : index
    %c0_14 = arith.constant 0 : index
    %17 = vector.load %arg2[%c2, %c0_13, %c0_14] : memref<3x128x128xf32, #tpu.memory_space<vmem>>, vector<1x128x128xf32>
    %18 = vector.shape_cast %17 : vector<1x128x128xf32> to vector<128x128xf32>
    %cst_15 = arith.constant dense<0.000000e+00> : vector<8x128xf32>
    %19 = tpu.matmul %16, %18, %cst_15 {dimension_numbers = #tpu.dot_dimension_numbers<[1], [0], [0], [1], [0, 0, 1, 1], [], []>} : vector<8x128xf32>, vector<128x128xf32>, vector<8x128xf32> -> vector<8x128xf32>
    %c2_16 = arith.constant 2 : index
    %c0_17 = arith.constant 0 : index
    %c0_18 = arith.constant 0 : index
    %20 = vector.load %arg3[%c2_16, %c0_17, %c0_18] : memref<3x1x128xf32, #tpu.memory_space<vmem>>, vector<1x1x128xf32>
    %21 = vector.shape_cast %20 : vector<1x1x128xf32> to vector<1x128xf32>
    %22 = vector.broadcast %21 : vector<1x128xf32> to vector<8x128xf32>
    %23 = arith.addf %19, %22 : vector<8x128xf32>
    %24 = tpu.iota {dimensions = array<i32: 1>} : vector<1x128xi32>
    %c4_i32 = arith.constant 4 : i32
    %25 = vector.broadcast %c4_i32 : i32 to vector<1x128xi32>
    %26 = arith.cmpi sge, %24, %25 : vector<1x128xi32>
    %27 = math.exp %23 : vector<8x128xf32>
    %28 = vector.shape_cast %26 : vector<1x128xi1> to vector<1x128xi1>
    %29 = vector.broadcast %28 : vector<1x128xi1> to vector<8x128xi1>
    %30 = arith.select %29, %27, %23 : vector<8x128xi1>, vector<8x128xf32>
    %c0_19 = arith.constant 0 : index
    %c0_20 = arith.constant 0 : index
    %31 = vector.load %arg4[%c0_19, %c0_20] : memref<8x128xf32, #tpu.memory_space<vmem>>, vector<8x128xf32>
    tpu.vector_store %arg4[%c0_19, %c0_20], %30 {strides = array<i32>} : memref<8x128xf32, #tpu.memory_space<vmem>>, vector<8x128xf32>,
    return
  }
  func.func @transform_0(%arg0: i32) -> (i32, i32) {
    %c0_i32 = arith.constant 0 : i32
    %c0_i32_0 = arith.constant 0 : i32
    return %arg0, %c0_i32 : i32, i32
  }
  func.func @transform_1(%arg0: i32) -> (i32, i32, i32) {
    %c0_i32 = arith.constant 0 : i32
    %c0_i32_0 = arith.constant 0 : i32
    %c0_i32_1 = arith.constant 0 : i32
    %c0_i32_2 = arith.constant 0 : i32
    return %c0_i32, %c0_i32_0, %c0_i32_1 : i32, i32, i32
  }
  func.func @transform_2(%arg0: i32) -> (i32, i32, i32) {
    %c0_i32 = arith.constant 0 : i32
    %c0_i32_0 = arith.constant 0 : i32
    %c0_i32_1 = arith.constant 0 : i32
    %c0_i32_2 = arith.constant 0 : i32
    return %c0_i32, %c0_i32_0, %c0_i32_1 : i32, i32, i32
  }
  func.func @transform_3(%arg0: i32) -> (i32, i32) {
    %c0_i32 = arith.constant 0 : i32
    %c0_i32_0 = arith.constant 0 : i32
    return %arg0, %c0_i32 : i32, i32
  }
}

</mosaic_0001>

<bundles_post_ra>
// kernel: tpu_custom_call.1
= control target key start
LH: loop header
LB: loop body
LE: loop exit
PB: predicated region body
PF: predicated region fallthrough
CT: control target
= control target key end

     0   :  { %8 = vsyncpa [#allocation3], 0  ;;  %s626_s0 = inlined_call_operand.hbm [shape: f32[8,16], index: 0, kind: input, shape index: {}]   ;;  %s627_s1 = inlined_call_operand.hbm [shape: f32[3,128,128], index: 1, kind: input, shape index: {}]   ;;  %s628_s2 = inlined_call_operand.vmem [shape: f32[3,1,128], index: 2, kind: input, shape index: {}]   ;;  %s629_s3 = inlined_call_operand.hbm [shape: f32[8,128], index: 3, kind: output, shape index: {}]  }
   0x1   :  { %9 = vsyncpa [#allocation6], 0 }
   0x2   :  { %10 = vsyncpa [#allocation4], 0  ;;  %s541_s12 = smov [#allocation2]   ;;  %s542_s14 = smov [#allocation5]  }
   0x3   :  { %s17_s13 = sshll.u32 %s541_s12, 4  ;;  %s26_s15 = sshll.u32 %s542_s14, 4  ;;  %s18_s13 = int_to_ptr.vmem [resolvable:$true] %s17_s13  ;;  %s27_s15 = int_to_ptr.vmem [resolvable:$true] %s26_s15 }
   0x4   :  { %s483_s16 = scalar_lea.vmem %s18_s13, 128  ;;  %p488_p1 = scmp.lt.s32.totalorder %s18_s13, %s18_s13 }
   0x5   :  { %p484_p0 = scmp.ne.s32.totalorder %s18_s13, %s483_s16  ;;  %p489_p2 = scmp.lt.s32.totalorder %s483_s16, %s483_s16 }
   0x7   :  { %p490_p3 = por %p489_p2, %p488_p1 }
   0x9   :  { %p491_p4 = pnand %p490_p3, %p484_p0 }
   0xb   :  { %494 = shalt.err (!%p491_p4)
}
   0xc   :  { %20 = dma.hbm_to_vmem [thread:$0]  %s626_s0, 128, %s18_s13, [#allocation3]  }
   0xd   :  { %s503_s19 = scalar_lea.vmem %s27_s15, 6144  ;;  %p508_p6 = scmp.lt.s32.totalorder %s27_s15, %s27_s15 }
   0xe   :  { %p504_p5 = scmp.ne.s32.totalorder %s27_s15, %s503_s19  ;;  %p509_p7 = scmp.lt.s32.totalorder %s503_s19, %s503_s19 }
  0x10   :  { %p510_p8 = por %p509_p7, %p508_p6 }
  0x12   :  { %p511_p9 = pnand %p510_p8, %p504_p5 }
  0x14   :  { %514 = shalt.err (!%p511_p9)
}
  0x15   :  { %s543_s20 = smov 128   ;;  %s544_s21 = smov 8  }
  0x16   :  { %32 = dma.hbm_to_vmem [thread:$0]  %s627_s1, 6144, %s27_s15, [#allocation6], %s543_s20, %s543_s20, %s544_s21  }
  0x17   :  { %535 = dma.done.wait [#allocation3], 128  }
  0x18   :  { %536 = vsyncadd [#allocation3], 4294967168 }
  0x19   :  { %537 = dma.done.wait [#allocation6], 6144  }
  0x1a   :  { %538 = vsyncadd [#allocation6], 4294961152  ;;  %v545_v0 = vmov 0.0   ;;  %vm546_vm0 = vmmov 0   ;;  %v43_v1 = vld [vmem:[#allocation5 + $0x8] sm:$0xff]  ;;  %v42_v2 = vld [vmem:[#allocation5] sm:$0xff]  ;;  %v317_v51 = vlaneseq }
  0x1b   :  { %385 = vmatprep.subr.mxu0 %v545_v0  ;;  %389 = vmatprep.mubr.msk.f32.mxu0 %vm546_vm0, %v545_v0  ;;  %v41_v3 = vld [vmem:[#allocation2] sm:$0xff]  ;;  %vm51_vm1 = vcmask 130048   ;;  %v141_v5 = vld [vmem:[#allocation5 + $0xf0] sm:$0xff]  ;;  %v140_v6 = vld [vmem:[#allocation5 + $0xe8] sm:$0xff]  ;;  %s547_s28 = smov [#allocation7]  }
  0x1c   :  { %392 = vmatprep.subr.mxu1 %v545_v0  ;;  %424 = vmatprep.mubr.msk.f32.mxu1 %vm546_vm0, %v545_v0  ;;  %v142_v4 = vld [vmem:[#allocation5 + $0xf8] sm:$0xff]  ;;  %v139_v7 = vld [vmem:[#allocation5 + $0xe0] sm:$0xff]  ;;  %v137_v9 = vld [vmem:[#allocation5 + $0xd0] sm:$0xff]  ;;  %v318_v52 = vand.u32 127, %v317_v51  ;;  %s332_s29 = sshll.u32 %s547_s28, 4  ;;  %s333_s29 = int_to_ptr.vmem [resolvable:$true] %s332_s29 }
  0x1d   :  { %386 = vmatpush3.msra.mxu0 %v43_v1  ;;  %393 = vmatpush3.msra.mxu1 %v142_v4  ;;  %v138_v8 = vld [vmem:[#allocation5 + $0xd8] sm:$0xff]  ;;  %v136_v10 = vld [vmem:[#allocation5 + $0xc8] sm:$0xff]  ;;  %v135_v11 = vld [vmem:[#allocation5 + $0xc0] sm:$0xff]  ;;  %s515_s30 = scalar_lea.vmem %s333_s29, 128  ;;  %p520_p11 = scmp.lt.s32.totalorder %s333_s29, %s333_s29 }
  0x1e   :  { %387 = vmatprep.subr.mxu0 %v545_v0  ;;  %394 = vmatprep.subr.mxu1 %v545_v0  ;;  %v134_v12 = vld [vmem:[#allocation5 + $0xb8] sm:$0xff]  ;;  %v133_v13 = vld [vmem:[#allocation5 + $0xb0] sm:$0xff]  ;;  %v132_v14 = vld [vmem:[#allocation5 + $0xa8] sm:$0xff]  ;;  %vm319_vm2 = vcmp.ge.s32.totalorder %v318_v52, 4  ;;  %p516_p10 = scmp.ne.s32.totalorder %s333_s29, %s515_s30  ;;  %p521_p12 = scmp.lt.s32.totalorder %s515_s30, %s515_s30 }
  0x1f   :  { %388 = vmatpush3.msra.mxu0 %v42_v2  ;;  %395 = vmatpush3.msra.mxu1 %v141_v5  ;;  %v131_v15 = vld [vmem:[#allocation5 + $0xa0] sm:$0xff]  ;;  %v130_v16 = vld [vmem:[#allocation5 + $0x98] sm:$0xff]  ;;  %v129_v17 = vld [vmem:[#allocation5 + $0x90] sm:$0xff] }
  0x20   :  { %390 = vmatmul.mubr.msk.f32.vlgmr.msra.gmra.mxu0 %vm51_vm1, %v41_v3  ;;  %396 = vmatprep.subr.mxu1 %v545_v0  ;;  %v128_v18 = vld [vmem:[#allocation5 + $0x88] sm:$0xff]  ;;  %v127_v19 = vld [vmem:[#allocation5 + $0x80] sm:$0xff]  ;;  %v238_v20 = vld [vmem:[#allocation5 + $0x178] sm:$0xff]  ;;  %p522_p13 = por %p521_p12, %p520_p11 }
  0x21   :  { %427 = vmatprep.subr.mxu0 %v545_v0  ;;  %397 = vmatpush3.msra.mxu1 %v140_v6  ;;  %v237_v21 = vld [vmem:[#allocation5 + $0x170] sm:$0xff]  ;;  %v236_v22 = vld [vmem:[#allocation5 + $0x168] sm:$0xff]  ;;  %v235_v23 = vld [vmem:[#allocation5 + $0x160] sm:$0xff] }
  0x22   :  { %459 = vmatprep.mubr.msk.f32.mxu0 %vm546_vm0, %v545_v0  ;;  %398 = vmatprep.subr.mxu1 %v545_v0  ;;  %v234_v24 = vld [vmem:[#allocation5 + $0x158] sm:$0xff]  ;;  %v233_v25 = vld [vmem:[#allocation5 + $0x150] sm:$0xff]  ;;  %v232_v26 = vld [vmem:[#allocation5 + $0x148] sm:$0xff]  ;;  %p523_p0 = pnand %p522_p13, %p516_p10 }
  0x23   :  { %399 = vmatpush3.msra.mxu1 %v139_v7  ;;  %428 = vmatpush3.msra.mxu0 %v238_v20  ;;  %v342_v27 = vld [vmem:[%s628_s2] ss:$0 sm:$0xff]  ;;  %v231_v32 = vld [vmem:[#allocation5 + $0x140] sm:$0xff]  ;;  %v229_v34 = vld [vmem:[#allocation5 + $0x130] sm:$0xff] }
  0x24   :  { %400 = vmatprep.subr.mxu1 %v545_v0  ;;  %429 = vmatprep.subr.mxu0 %v545_v0  ;;  %v230_v33 = vld [vmem:[#allocation5 + $0x138] sm:$0xff]  ;;  %v228_v35 = vld [vmem:[#allocation5 + $0x128] sm:$0xff]  ;;  %v227_v36 = vld [vmem:[#allocation5 + $0x120] sm:$0xff] }
  0x25   :  { %401 = vmatpush3.msra.mxu1 %v138_v8  ;;  %430 = vmatpush3.msra.mxu0 %v237_v21  ;;  %v226_v37 = vld [vmem:[#allocation5 + $0x118] sm:$0xff]  ;;  %v225_v38 = vld [vmem:[#allocation5 + $0x110] sm:$0xff]  ;;  %v224_v39 = vld [vmem:[#allocation5 + $0x108] sm:$0xff] }
  0x26   :  { %402 = vmatprep.subr.mxu1 %v545_v0  ;;  %431 = vmatprep.subr.mxu0 %v545_v0  ;;  %v223_v40 = vld [vmem:[#allocation5 + $0x100] sm:$0xff]  ;;  %v345_v41 = vld [vmem:[%s628_s2 + $0x1] ss:$0 sm:$0xff]  ;;  %v347_v46 = vld [vmem:[%s628_s2 + $0x2] ss:$0 sm:$0xff] }
  0x27   :  { %403 = vmatpush3.msra.mxu1 %v137_v9  ;;  %432 = vmatpush3.msra.mxu0 %v236_v22 }
  0x28   :  { %404 = vmatprep.subr.mxu1 %v545_v0  ;;  %433 = vmatprep.subr.mxu0 %v545_v0 }
  0x29   :  { %405 = vmatpush3.msra.mxu1 %v136_v10  ;;  %434 = vmatpush3.msra.mxu0 %v235_v23 }
  0x2a   :  { %406 = vmatprep.subr.mxu1 %v545_v0  ;;  %435 = vmatprep.subr.mxu0 %v545_v0 }
  0x2b   :  { %407 = vmatpush3.msra.mxu1 %v135_v11  ;;  %436 = vmatpush3.msra.mxu0 %v234_v24 }
  0x2c   :  { %408 = vmatprep.subr.mxu1 %v545_v0  ;;  %437 = vmatprep.subr.mxu0 %v545_v0 }
  0x2d   :  { %409 = vmatpush3.msra.mxu1 %v134_v12  ;;  %438 = vmatpush3.msra.mxu0 %v233_v25 }
  0x2e   :  { %410 = vmatprep.subr.mxu1 %v545_v0  ;;  %439 = vmatprep.subr.mxu0 %v545_v0 }
  0x2f   :  { %411 = vmatpush3.msra.mxu1 %v133_v13  ;;  %440 = vmatpush3.msra.mxu0 %v232_v26 }
  0x30   :  { %412 = vmatprep.subr.mxu1 %v545_v0  ;;  %441 = vmatprep.subr.mxu0 %v545_v0 }
  0x31   :  { %413 = vmatpush3.msra.mxu1 %v132_v14  ;;  %442 = vmatpush3.msra.mxu0 %v231_v32 }
  0x32   :  { %414 = vmatprep.subr.mxu1 %v545_v0  ;;  %443 = vmatprep.subr.mxu0 %v545_v0 }
  0x33   :  { %415 = vmatpush3.msra.mxu1 %v131_v15  ;;  %444 = vmatpush3.msra.mxu0 %v230_v33 }
  0x34   :  { %416 = vmatprep.subr.mxu1 %v545_v0  ;;  %445 = vmatprep.subr.mxu0 %v545_v0 }
  0x35   :  { %417 = vmatpush3.msra.mxu1 %v130_v16  ;;  %446 = vmatpush3.msra.mxu0 %v229_v34 }
  0x36   :  { %418 = vmatprep.subr.mxu1 %v545_v0  ;;  %447 = vmatprep.subr.mxu0 %v545_v0 }
  0x37   :  { %419 = vmatpush3.msra.mxu1 %v129_v17  ;;  %448 = vmatpush3.msra.mxu0 %v228_v35 }
  0x38   :  { %420 = vmatprep.subr.mxu1 %v545_v0  ;;  %449 = vmatprep.subr.mxu0 %v545_v0 }
  0x39   :  { %421 = vmatpush3.msra.mxu1 %v128_v18  ;;  %450 = vmatpush3.msra.mxu0 %v227_v36 }
  0x3a   :  { %422 = vmatprep.subr.mxu1 %v545_v0  ;;  %451 = vmatprep.subr.mxu0 %v545_v0 }
  0x3b   :  { %423 = vmatpush3.msra.mxu1 %v127_v19  ;;  %452 = vmatpush3.msra.mxu0 %v226_v37 }
  0x3c   :  { %453 = vmatprep.subr.mxu0 %v545_v0 }
  0x3d   :  { %454 = vmatpush3.msra.mxu0 %v225_v38 }
  0x3e   :  { %455 = vmatprep.subr.mxu0 %v545_v0 }
  0x3f   :  { %456 = vmatpush3.msra.mxu0 %v224_v39 }
  0x40   :  { %457 = vmatprep.subr.mxu0 %v545_v0 }
  0x41   :  { %458 = vmatpush3.msra.mxu0 %v223_v40 }
  0xe0   :  { %v121_v28 = vpop.f32.mrf.mxu0 }
  0xe1   :  { %v122_v29 = vadd.f32 %v342_v27, %v121_v28 }
  0xe2   :  { %v391_v30 = vpop.f32.mrf.mxu0 }
  0xe3   :  { %469 = vtanh.f32 %v122_v29 }
  0xf0   :  { %v470_v31 = vpop.eup %469 }
  0xf1   :  { %425 = vmatmul.mubr.f32.vlgmr.msra.gmra.mxu1 %v470_v31 }
 0x1b1   :  { %v217_v42 = vpop.f32.mrf.mxu1 }
 0x1b2   :  { %v218_v43 = vadd.f32 %v345_v41, %v217_v42 }
 0x1b3   :  { %v426_v44 = vpop.f32.mrf.mxu1 }
 0x1b4   :  { %471 = vtanh.f32 %v218_v43 }
 0x1c1   :  { %v472_v45 = vpop.eup %471 }
 0x1c2   :  { %460 = vmatmul.mubr.f32.vlgmr.msra.gmra.mxu0 %v472_v45 }
 0x282   :  { %v313_v47 = vpop.f32.mrf.mxu0 }
 0x283   :  { %v314_v48 = vadd.f32 %v347_v46, %v313_v47 }
 0x284   :  { %v461_v49 = vpop.f32.mrf.mxu0 }
 0x285   :  { %v320_v50 = vmul.f32 1.442695, %v314_v48 }
 0x287   :  { %473 = vpow2.f32 %v320_v50 }
 0x294   :  { %v474_v53 = vpop.eup %473 }
 0x295   :  { %v324_v54 = vsel %vm319_vm2, %v474_v53, %v314_v48 }
 0x296   :  { %325 = vst [vmem:[#allocation7] sm:$0xff] %v324_v54 }
 0x297   :  { %526 = shalt.err (!%p523_p0)
}
 0x298   :  { %335 = dma.vmem_to_hbm [thread:$0]  %s333_s29, 128, %s629_s3, [#allocation4]  }
 0x299   :  { %539 = dma.done.wait [#allocation4], 128  }
 0x29a   :  { %540 = vsyncadd [#allocation4], 4294967168 }
 0x29b   :  { %339 = vsyncpa [#allocation3], 1 }
 0x29c   :  { %340 = vsyncpa [#allocation6], 1 }
 0x29d   :  { %341 = vsyncpa [#allocation4], 1 }

</bundles_post_ra>
